<compile_context>
chip_gen: v7x
topology: tpu7x:2x2x1
jax: 0.10.0
libtpu: 0.0.40
codegen_flags: <defaults>
</compile_context>

<pallas_src>
import functools

import jax
import jax.numpy as jnp
from jax.experimental import pallas as pl
from jax.experimental.pallas import tpu as pltpu

_LANE = 128
_SUBLANE = 8
_NEG_BIG = -1e30          # padded-class bias -> exp underflows to exactly 0
_TM_CAP = 16 * 1024       # hard cap on the batch tile
_XLA_FALLBACK_ROWS = 256  # below this, plain XLA fuses the op cheaper than a kernel launch


def _round_up(n, m):
    return ((n + m - 1) // m) * m


def discriminator_kernel(x_ref, w_ref, b_ref, o_ref):
    """One batch tile: logits^T = W @ x^T + b, softmax over the class (sublane) axis.

    x_ref: (tm, H)    input tile (native dtype), batch on sublanes
    w_ref: (C8, H)    zero-padded nn.Linear weight, classes on sublanes
    b_ref: (C8, 1)    f32 bias; padded class rows carry -1e30
    o_ref: (C8, tm)   f32 probabilities, classes on sublanes, batch on lanes (lane-dense)
    """
    xv = x_ref[...].astype(jnp.float32)   # matches PyTorch x.float()
    wv = w_ref[...].astype(jnp.float32)

    # (C8, tm) = W . x^T : contract H of both operands (standard q@k^T pattern on the MXU).
    # Classes land on sublanes, batch on lanes -> no 128-lane class padding in the output.
    logits = jax.lax.dot_general(
        wv, xv,
        dimension_numbers=(((1,), (1,)), ((), ())),
        preferred_element_type=jnp.float32,
    ) + b_ref[...]

    # Numerically stable softmax over the class (sublane) axis.  Padded class rows hold
    # -1e30 logits -> exp == 0 -> they do not dilute the denominator.
    m = jnp.max(logits, axis=0, keepdims=True)
    e = jnp.exp(logits - m)
    s = jnp.sum(e, axis=0, keepdims=True)
    o_ref[...] = (e / s).astype(o_ref.dtype)   # exact divide: HBM-bound, it is free


def _xla_forward(x, weight, bias):
    logits = jnp.dot(x.astype(jnp.float32), weight.astype(jnp.float32).T) + \
        bias.astype(jnp.float32)
    return jnp.squeeze(jax.nn.softmax(logits, axis=-1))


@functools.partial(jax.jit, static_argnames=("force_pallas",))
def discriminator_forward(x, weight, bias, *, force_pallas=False):
    """x: (B, H); weight: (C, H) [nn.Linear layout]; bias: (C,).

    Returns softmax(x.float() @ W^T + b, axis=-1).squeeze() in float32.
    """
    B, H = x.shape
    C = weight.shape[0]
    C8 = max(_SUBLANE, _round_up(C, _SUBLANE))   # classes padded to a sublane group only

    if not force_pallas and B <= _XLA_FALLBACK_ROWS:
        # Tiny batches: pallas_call fixed overhead + padding dominate; let XLA fuse it.
        return _xla_forward(x, weight, bias)

    # ---- generation-aware VMEM budget and batch tile ----
    try:
        vmem_cap = int(pltpu.get_tpu_info().vmem_capacity_bytes)
    except Exception:
        vmem_cap = 64 * 1024 * 1024            # conservative (v7x per-TC VMEM)
    vmem_limit = int(min(vmem_cap // 2, 96 * 1024 * 1024))
    budget = vmem_limit // 2                    # headroom for compiler-managed temps

    x_bytes = jnp.dtype(x.dtype).itemsize
    h_lanes = _round_up(H, _LANE)               # VMEM lane padding of the minor dim
    # per batch row: double-buffered x tile + f32 upcast temp + out/intermediates
    per_row = 2 * h_lanes * x_bytes + h_lanes * 4 + 8 * C8 * 4
    tm_cap = max(_LANE, min(_TM_CAP, (budget // per_row) // _LANE * _LANE))

    B128 = _round_up(B, _LANE)
    tm = min(tm_cap, B128)
    # v7x megacore: if the whole batch fits one tile but spans >= 2 lane groups, split it
    # so the "parallel" grid axis has work for both TensorCores.
    if tm >= B128 and B128 >= 2 * _LANE:
        tm = _round_up(B128 // 2, _LANE)
    # Prefer a similarly-sized tile that divides B exactly -> no wrapper-side x pad copy.
    if B % tm != 0 and B % _LANE == 0:
        lo = max(tm // 2, _LANE)
        d = tm
        while d >= lo and B % d != 0:
            d -= _LANE
        if d >= lo and B % d == 0:
            tm = d
    B_pad = _round_up(B, tm)
    grid_b = B_pad // tm

    # Pad x only when actually needed (avoids an extra full HBM read+write of x).
    x_p = x if B_pad == B else jnp.zeros((B_pad, H), x.dtype).at[:B, :].set(x)
    # Tiny one-time parameter padding (classes -> one sublane group).
    w_p = jnp.zeros((C8, H), weight.dtype).at[:C, :].set(weight)
    b_p = jnp.full((C8, 1), _NEG_BIG, jnp.float32).at[:C, 0].set(bias.astype(jnp.float32))

    out = pl.pallas_call(
        discriminator_kernel,
        out_shape=jax.ShapeDtypeStruct((C8, B_pad), jnp.float32),
        grid=(grid_b,),
        in_specs=[
            pl.BlockSpec((tm, H), lambda i: (i, 0)),    # pipelined batch tiles
            pl.BlockSpec((C8, H), lambda i: (0, 0)),    # weight resident across tiles
            pl.BlockSpec((C8, 1), lambda i: (0, 0)),    # bias resident across tiles
        ],
        out_specs=pl.BlockSpec((C8, tm), lambda i: (0, i)),
        compiler_params=pltpu.CompilerParams(
            dimension_semantics=("parallel",),          # independent batch tiles
            vmem_limit_bytes=vmem_limit,
        ),
    )(x_p, w_p, b_p)

    # (C8, B_pad) -> (B, C) (tiny transpose), then PyTorch-style .squeeze().
    return jnp.squeeze(out[:C, :B].T)


if __name__ == "__main__":
    # Small shapes consistent with the module:
    # hidden_size=32, classes=4, batch_size=2 (voc_size / emb_size unused in forward)
    hidden_size, classes, batch = 32, 4, 2

    key = jax.random.PRNGKey(0)
    kx, kw, kb = jax.random.split(key, 3)

    bound = 1.0 / (hidden_size ** 0.5)
    weight = jax.random.uniform(kw, (classes, hidden_size), jnp.float32, -bound, bound)
    bias = jax.random.uniform(kb, (classes,), jnp.float32, -bound, bound)

    def reference(xs):
        return jnp.squeeze(jax.nn.softmax(
            jnp.dot(xs.astype(jnp.float32), weight.T,
                    precision=jax.lax.Precision.HIGHEST) + bias, axis=-1))

    # 1) Module-sized batch (Pallas path forced so the kernel itself is exercised).
    x = jax.random.normal(kx, (batch, hidden_size), jnp.float32)
    out = jax.block_until_ready(discriminator_forward(x, weight, bias, force_pallas=True))
    ref = reference(x)
    assert out.shape == ref.shape == (batch, classes)
    assert bool(jnp.allclose(jnp.sum(out, axis=-1), 1.0, atol=1e-5))
    assert bool(jnp.allclose(out, ref, atol=1e-3, rtol=1e-3))

    # 2) Larger batch exercising the multi-tile / no-padding path.
    x_big = jax.random.normal(jax.random.PRNGKey(1), (384, hidden_size), jnp.float32)
    out_big = jax.block_until_ready(
        discriminator_forward(x_big, weight, bias, force_pallas=True))
    ref_big = reference(x_big)
    assert out_big.shape == ref_big.shape == (384, classes)
    assert bool(jnp.allclose(jnp.sum(out_big, axis=-1), 1.0, atol=1e-5))
    assert bool(jnp.allclose(out_big, ref_big, atol=1e-3, rtol=1e-3))

    print("KERNEL_OK")
</pallas_src>

<mosaic_0001>
module attributes {stable_mosaic.version = 11 : i64} {
  func.func @discriminator_kernel(%arg0: i32, %arg1: memref<128x32xf32, #tpu.memory_space<vmem>>, %arg2: memref<8x32xf32, #tpu.memory_space<vmem>>, %arg3: memref<8x1xf32, #tpu.memory_space<vmem>>, %arg4: memref<8x128xf32, #tpu.memory_space<vmem>>) attributes {dimension_semantics = [#tpu.dimension_semantics<parallel>], iteration_bounds = array<i64: 1>, scalar_prefetch = 0 : i64, scratch_operands = 0 : i64, tpu.core_type = #tpu.core_type<tc>, window_params = [{transform_indices = @transform_0, window_bounds = array<i64: 128, 32>}, {pipeline_mode = #tpu.pipeline_mode<synchronous>, transform_indices = @transform_1, window_bounds = array<i64: 8, 32>}, {pipeline_mode = #tpu.pipeline_mode<synchronous>, transform_indices = @transform_2, window_bounds = array<i64: 8, 1>}, {transform_indices = @transform_3, window_bounds = array<i64: 8, 128>}]} {
    %c0 = arith.constant 0 : index
    %c0_0 = arith.constant 0 : index
    %0 = vector.load %arg1[%c0, %c0_0] : memref<128x32xf32, #tpu.memory_space<vmem>>, vector<128x32xf32>
    %c0_1 = arith.constant 0 : index
    %c0_2 = arith.constant 0 : index
    %1 = vector.load %arg2[%c0_1, %c0_2] : memref<8x32xf32, #tpu.memory_space<vmem>>, vector<8x32xf32>
    %cst = arith.constant dense<0.000000e+00> : vector<8x128xf32>
    %2 = tpu.matmul %1, %0, %cst {dimension_numbers = #tpu.dot_dimension_numbers<[1], [1], [0], [0], [0, 0, 1, 0], [], []>} : vector<8x32xf32>, vector<128x32xf32>, vector<8x128xf32> -> vector<8x128xf32>
    %c0_3 = arith.constant 0 : index
    %c0_4 = arith.constant 0 : index
    %3 = vector.load %arg3[%c0_3, %c0_4] : memref<8x1xf32, #tpu.memory_space<vmem>>, vector<8x1xf32>
    %4 = vector.broadcast %3 : vector<8x1xf32> to vector<8x128xf32>
    %5 = arith.addf %2, %4 : vector<8x128xf32>
    %cst_5 = arith.constant dense<0xFF800000> : vector<128xf32>
    %6 = vector.multi_reduction <maximumf>, %5, %cst_5 [0] : vector<8x128xf32> to vector<128xf32>
    %7 = vector.shape_cast %6 : vector<128xf32> to vector<1x128xf32>
    %8 = vector.broadcast %7 : vector<1x128xf32> to vector<8x128xf32>
    %9 = arith.subf %5, %8 : vector<8x128xf32>
    %10 = math.exp %9 : vector<8x128xf32>
    %cst_6 = arith.constant dense<0.000000e+00> : vector<128xf32>
    %11 = vector.multi_reduction <add>, %10, %cst_6 [0] : vector<8x128xf32> to vector<128xf32>
    %12 = vector.shape_cast %11 : vector<128xf32> to vector<1x128xf32>
    %13 = vector.broadcast %12 : vector<1x128xf32> to vector<8x128xf32>
    %14 = arith.divf %10, %13 : vector<8x128xf32>
    %c0_7 = arith.constant 0 : index
    %c0_8 = arith.constant 0 : index
    %15 = vector.load %arg4[%c0_7, %c0_8] : memref<8x128xf32, #tpu.memory_space<vmem>>, vector<8x128xf32>
    tpu.vector_store %arg4[%c0_7, %c0_8], %14 {strides = array<i32>} : memref<8x128xf32, #tpu.memory_space<vmem>>, vector<8x128xf32>,
    return
  }
  func.func @transform_0(%arg0: i32) -> (i32, i32) {
    %c0_i32 = arith.constant 0 : i32
    %c0_i32_0 = arith.constant 0 : i32
    return %arg0, %c0_i32 : i32, i32
  }
  func.func @transform_1(%arg0: i32) -> (i32, i32) {
    %c0_i32 = arith.constant 0 : i32
    %c0_i32_0 = arith.constant 0 : i32
    %c0_i32_1 = arith.constant 0 : i32
    return %c0_i32, %c0_i32_0 : i32, i32
  }
  func.func @transform_2(%arg0: i32) -> (i32, i32) {
    %c0_i32 = arith.constant 0 : i32
    %c0_i32_0 = arith.constant 0 : i32
    %c0_i32_1 = arith.constant 0 : i32
    return %c0_i32, %c0_i32_0 : i32, i32
  }
  func.func @transform_3(%arg0: i32) -> (i32, i32) {
    %c0_i32 = arith.constant 0 : i32
    %c0_i32_0 = arith.constant 0 : i32
    return %c0_i32, %arg0 : i32, i32
  }
}

</mosaic_0001>

<bundles_post_ra>
// kernel: discriminator_forward.1
= control target key start
LH: loop header
LB: loop body
LE: loop exit
PB: predicated region body
PF: predicated region fallthrough
CT: control target
= control target key end

     0   :  { %vm37_vm0 = vcmask 261120   ;;  %v291_v0 = vmov 0.0|0.0   ;;  %vm292_vm2 = vmmov 0   ;;  %v293_v4 = vmov 0.0   ;;  %s395_s0 = inlined_call_operand.vmem [shape: f32[128,32], index: 0, kind: input, shape index: {}]   ;;  %s396_s2 = inlined_call_operand.vmem [shape: f32[8,1], index: 2, kind: input, shape index: {}]   ;;  %s397_s1 = inlined_call_operand.vmem [shape: f32[8,32], index: 1, kind: input, shape index: {}]   ;;  %s398_s3 = inlined_call_operand.vmem [shape: f32[8,128], index: 3, kind: output, shape index: {}]  }
   0x1   :  { %250 = vmatprep.subr.bf16.mxu0 %v291_v0  ;;  %v14_v1 = vld [vmem:[%s395_s0] sm:$0xff]  ;;  %v15_v2 = vld [vmem:[%s395_s0 + $0x8] sm:$0xff]  ;;  %vm323_vm1 = vmpackc.low %vm37_vm0, %vm37_vm0  ;;  %247 = vmatprep.mubr.msk.f32.mxu0 %vm292_vm2, %v293_v4  ;;  %v294_v6 = vmov 0  }
   0x2   :  { %v251_v5 = vpack.c.bf16 %v15_v2, %v14_v1  ;;  %286 = vset.pattern.permute.xlu0 %v294_v6  ;;  %v16_v7 = vld [vmem:[%s395_s0 + $0x10] sm:$0xff]  ;;  %v17_v8 = vld [vmem:[%s395_s0 + $0x18] sm:$0xff]  ;;  %v31_v9 = vld [vmem:[%s396_s2] sm:$0xff] }
   0x3   :  { %v255_v10 = vpack.c.bf16 %v17_v8, %v16_v7  ;;  %34 = vperm.xlu0 %286, %v31_v9   ;;  %v18_v11 = vld [vmem:[%s395_s0 + $0x20] sm:$0xff]  ;;  %v19_v12 = vld [vmem:[%s395_s0 + $0x28] sm:$0xff]  ;;  %v20_v14 = vld [vmem:[%s395_s0 + $0x30] sm:$0xff] }
   0x4   :  { %253 = vmatpush3.bf16.xpose.msk.msra.mxu0 %vm323_vm1, %v251_v5  ;;  %v259_v13 = vpack.c.bf16 %v19_v12, %v18_v11  ;;  %v21_v15 = vld [vmem:[%s395_s0 + $0x38] sm:$0xff]  ;;  %v22_v17 = vld [vmem:[%s395_s0 + $0x40] sm:$0xff]  ;;  %v23_v18 = vld [vmem:[%s395_s0 + $0x48] sm:$0xff] }
   0x5   :  { %254 = vmatprep.subr.bf16.mxu0 %v291_v0  ;;  %v263_v16 = vpack.c.bf16 %v21_v15, %v20_v14  ;;  %v267_v19 = vpack.c.bf16 %v23_v18, %v22_v17  ;;  %v24_v20 = vld [vmem:[%s395_s0 + $0x50] sm:$0xff]  ;;  %v25_v21 = vld [vmem:[%s395_s0 + $0x58] sm:$0xff]  ;;  %v26_v23 = vld [vmem:[%s395_s0 + $0x60] sm:$0xff] }
   0x6   :  { %v271_v22 = vpack.c.bf16 %v25_v21, %v24_v20  ;;  %v27_v24 = vld [vmem:[%s395_s0 + $0x68] sm:$0xff]  ;;  %v28_v26 = vld [vmem:[%s395_s0 + $0x70] sm:$0xff]  ;;  %v29_v27 = vld [vmem:[%s395_s0 + $0x78] sm:$0xff] }
   0x7   :  { %v275_v25 = vpack.c.bf16 %v27_v24, %v26_v23  ;;  %v279_v28 = vpack.c.bf16 %v29_v27, %v28_v26  ;;  %v30_v29 = vld [vmem:[%s397_s1] sm:$0xff] }
   0xc   :  { %257 = vmatpush3.bf16.xpose.msk.msra.mxu0 %vm323_vm1, %v255_v10 }
   0xd   :  { %258 = vmatprep.subr.bf16.mxu0 %v291_v0 }
  0x14   :  { %261 = vmatpush3.bf16.xpose.msk.msra.mxu0 %vm323_vm1, %v259_v13 }
  0x15   :  { %262 = vmatprep.subr.bf16.mxu0 %v291_v0 }
  0x1c   :  { %265 = vmatpush3.bf16.xpose.msk.msra.mxu0 %vm323_vm1, %v263_v16 }
  0x1d   :  { %266 = vmatprep.subr.bf16.mxu0 %v291_v0 }
  0x24   :  { %269 = vmatpush3.bf16.xpose.msk.msra.mxu0 %vm323_vm1, %v267_v19 }
  0x25   :  { %270 = vmatprep.subr.bf16.mxu0 %v291_v0 }
  0x2c   :  { %273 = vmatpush3.bf16.xpose.msk.msra.mxu0 %vm323_vm1, %v271_v22 }
  0x2d   :  { %274 = vmatprep.subr.bf16.mxu0 %v291_v0 }
  0x34   :  { %277 = vmatpush3.bf16.xpose.msk.msra.mxu0 %vm323_vm1, %v275_v25 }
  0x35   :  { %278 = vmatprep.subr.bf16.mxu0 %v291_v0 }
  0x3c   :  { %281 = vmatpush3.bf16.xpose.msk.msra.mxu0 %vm323_vm1, %v279_v28 }
  0x43   :  { %248 = vmatmul.mubr.msk.f32.vlgmr.msra.gmra.mrb[0].mxu0 %vm37_vm0, %v30_v29 }
  0x82   :  { %v35_v30 = vpop.permute.xlu0 %34 }
 0x116   :  { %v155_v31 = vpop.f32.mrb[0].mxu0 }
 0x117   :  { %v156_v32 = vadd.f32 %v155_v31, %v35_v30  ;;  %v249_v33 = vpop.f32.mrb[1].mxu0 }
 0x119   :  { %v159_v34 = vrot.slane %v156_v32, 4 }
 0x11b   :  { %v160_v35 = vmax.f32 %v156_v32, %v159_v34 }
 0x11d   :  { %v161_v36 = vrot.slane %v160_v35, 2 }
 0x11f   :  { %v162_v37 = vmax.f32 %v160_v35, %v161_v36 }
 0x121   :  { %v163_v38 = vrot.slane %v162_v37, 1 }
 0x123   :  { %v164_v39 = vmax.f32 %v162_v37, %v163_v38 }
 0x125   :  { %v165_v40 = vsub.f32 %v156_v32, %v164_v39 }
 0x127   :  { %v166_v41 = vmul.f32 1.442695, %v165_v40 }
 0x129   :  { %287 = vpow2.f32 %v166_v41 }
 0x133   :  { %v288_v42 = vpop.eup %287 }
 0x134   :  { %v168_v43 = vrot.slane %v288_v42, 4 }
 0x136   :  { %v169_v44 = vadd.f32 %v288_v42, %v168_v43 }
 0x138   :  { %v170_v45 = vrot.slane %v169_v44, 2 }
 0x13a   :  { %v171_v46 = vadd.f32 %v170_v45, %v169_v44 }
 0x13c   :  { %v172_v47 = vrot.slane %v171_v46, 1 }
 0x13e   :  { %v173_v48 = vadd.f32 %v172_v47, %v171_v46 }
 0x140   :  { %289 = vrcp.f32 %v173_v48 }
 0x14a   :  { %v290_v49 = vpop.eup %289 }
 0x14b   :  { %v175_v50 = vmul.f32 %v290_v49, %v288_v42 }
 0x14d   :  { %176 = vst [vmem:[%s398_s3] sm:$0xff] %v175_v50 }

</bundles_post_ra>
